<compile_context>
chip_gen: v7x
topology: tpu7x:2x2x1
jax: 0.10.0
libtpu: 0.0.40
codegen_flags: <defaults>
</compile_context>

<pallas_src>
import functools

import jax
import jax.numpy as jnp
from jax.experimental import pallas as pl
from jax.experimental.pallas import tpu as pltpu

INPUT_SIZE = 14
HIDDEN1 = 32
HIDDEN2 = 16
NUM_CLASSES = 2  # binary depression prediction (len(unique(y_train)) == 2)


def _mlp_kernel(x_ref, w1_ref, b1_ref, w2_ref, b2_ref, w3_ref, b3_ref, o_ref):
    # x_ref: (INPUT_SIZE, TILE_B) bf16  -- batch on the lane axis (lane dense)
    # w*_ref: (out, in) bf16, VMEM-resident across all grid steps
    # b*_ref: (out, 1)  f32, broadcast along lanes
    xb = x_ref[...]

    h1 = jnp.dot(w1_ref[...], xb, preferred_element_type=jnp.float32) + b1_ref[...]
    h1 = jnp.maximum(h1, 0.0).astype(jnp.bfloat16)

    h2 = jnp.dot(w2_ref[...], h1, preferred_element_type=jnp.float32) + b2_ref[...]
    h2 = jnp.maximum(h2, 0.0).astype(jnp.bfloat16)

    out = jnp.dot(w3_ref[...], h2, preferred_element_type=jnp.float32) + b3_ref[...]
    o_ref[...] = out.astype(o_ref.dtype)


@functools.partial(jax.jit, static_argnames=("tile_b",))
def depression_nn_forward(x, params, *, tile_b=2048):
    """x: (batch, 14) float32. params: weights stored (out, in), biases (out, 1).

    Returns (batch, NUM_CLASSES) float32 logits.

    Note: for tiny serving batches (<~1K rows) the pallas_call fixed overhead
    dominates; `reference_forward` (fused XLA) is the better dispatch there.
    This kernel targets large training/eval batches.
    """
    batch = x.shape[0]

    # Batch tile: multiple of 128 (lane width), no larger than the padded batch.
    tile_b = min(tile_b, pl.cdiv(batch, 128) * 128)
    tile_b = pl.cdiv(tile_b, 128) * 128
    padded = pl.cdiv(batch, tile_b) * tile_b

    # Transpose to (features, batch) and cast to bf16 for the HBM->VMEM transfer.
    xt = jnp.pad(x.T.astype(jnp.bfloat16), ((0, 0), (0, padded - batch)))

    w1 = params["w1"].astype(jnp.bfloat16)
    w2 = params["w2"].astype(jnp.bfloat16)
    w3 = params["w3"].astype(jnp.bfloat16)
    b1, b2, b3 = params["b1"], params["b2"], params["b3"]

    # Constant index_map -> loaded once, stays VMEM-resident across grid steps.
    const = lambda a: pl.BlockSpec(a.shape, lambda i: (0, 0))

    out_t = pl.pallas_call(
        _mlp_kernel,
        out_shape=jax.ShapeDtypeStruct((NUM_CLASSES, padded), jnp.float32),
        grid=(padded // tile_b,),
        in_specs=[
            pl.BlockSpec((INPUT_SIZE, tile_b), lambda i: (0, i)),
            const(w1), const(b1), const(w2), const(b2), const(w3), const(b3),
        ],
        out_specs=pl.BlockSpec((NUM_CLASSES, tile_b), lambda i: (0, i)),
        compiler_params=pltpu.CompilerParams(
            # Rows are independent -> shard the batch axis across v7x's 2 TCs;
            # harmless no-op on v5e/v6e (1 TC).
            dimension_semantics=("parallel",),
        ),
    )(xt, w1, b1, w2, b2, w3, b3)

    return out_t[:, :batch].T


def init_params(key):
    """PyTorch nn.Linear default init: U(-1/sqrt(fan_in), +1/sqrt(fan_in)).

    Weights stored (out_features, in_features) == PyTorch orientation; biases (out, 1).
    """
    def linear(k, fan_in, fan_out):
        kw, kb = jax.random.split(k)
        bound = 1.0 / jnp.sqrt(jnp.float32(fan_in))
        w = jax.random.uniform(kw, (fan_out, fan_in), jnp.float32, -bound, bound)
        b = jax.random.uniform(kb, (fan_out, 1), jnp.float32, -bound, bound)
        return w, b

    k1, k2, k3 = jax.random.split(key, 3)
    w1, b1 = linear(k1, INPUT_SIZE, HIDDEN1)
    w2, b2 = linear(k2, HIDDEN1, HIDDEN2)
    w3, b3 = linear(k3, HIDDEN2, NUM_CLASSES)
    return {"w1": w1, "b1": b1, "w2": w2, "b2": b2, "w3": w3, "b3": b3}


def reference_forward(x, params):
    """Pure-JAX reference mirroring the kernel math exactly (bf16 inputs, f32 acc)."""
    xb = x.T.astype(jnp.bfloat16)
    w1 = params["w1"].astype(jnp.bfloat16)
    w2 = params["w2"].astype(jnp.bfloat16)
    w3 = params["w3"].astype(jnp.bfloat16)

    h1 = jnp.dot(w1, xb, preferred_element_type=jnp.float32) + params["b1"]
    h1 = jnp.maximum(h1, 0.0).astype(jnp.bfloat16)
    h2 = jnp.dot(w2, h1, preferred_element_type=jnp.float32) + params["b2"]
    h2 = jnp.maximum(h2, 0.0).astype(jnp.bfloat16)
    out = jnp.dot(w3, h2, preferred_element_type=jnp.float32) + params["b3"]
    return out.T


if __name__ == "__main__":
    key = jax.random.PRNGKey(0)
    kx, kp = jax.random.split(key)

    batch = 8
    x = jax.random.normal(kx, (batch, INPUT_SIZE), jnp.float32)
    params = init_params(kp)

    out = depression_nn_forward(x, params)
    out = jax.block_until_ready(out)

    ref = reference_forward(x, params)
    assert out.shape == (batch, NUM_CLASSES), out.shape
    assert jnp.allclose(out, ref, atol=1e-4, rtol=1e-4), "mismatch vs pure-JAX reference"

    print("KERNEL_OK")
</pallas_src>

<mosaic_0001>
module attributes {stable_mosaic.version = 11 : i64} {
  func.func @_mlp_kernel(%arg0: i32, %arg1: memref<14x128xbf16, #tpu.memory_space<vmem>>, %arg2: memref<32x14xbf16, #tpu.memory_space<vmem>>, %arg3: memref<32x1xf32, #tpu.memory_space<vmem>>, %arg4: memref<16x32xbf16, #tpu.memory_space<vmem>>, %arg5: memref<16x1xf32, #tpu.memory_space<vmem>>, %arg6: memref<2x16xbf16, #tpu.memory_space<vmem>>, %arg7: memref<2x1xf32, #tpu.memory_space<vmem>>, %arg8: memref<2x128xf32, #tpu.memory_space<vmem>>) attributes {dimension_semantics = [#tpu.dimension_semantics<parallel>], iteration_bounds = array<i64: 1>, scalar_prefetch = 0 : i64, scratch_operands = 0 : i64, tpu.core_type = #tpu.core_type<tc>, window_params = [{transform_indices = @transform_0, window_bounds = array<i64: 14, 128>}, {pipeline_mode = #tpu.pipeline_mode<synchronous>, transform_indices = @transform_1, window_bounds = array<i64: 32, 14>}, {pipeline_mode = #tpu.pipeline_mode<synchronous>, transform_indices = @transform_2, window_bounds = array<i64: 32, 1>}, {pipeline_mode = #tpu.pipeline_mode<synchronous>, transform_indices = @transform_3, window_bounds = array<i64: 16, 32>}, {pipeline_mode = #tpu.pipeline_mode<synchronous>, transform_indices = @transform_4, window_bounds = array<i64: 16, 1>}, {pipeline_mode = #tpu.pipeline_mode<synchronous>, transform_indices = @transform_5, window_bounds = array<i64: 2, 16>}, {pipeline_mode = #tpu.pipeline_mode<synchronous>, transform_indices = @transform_6, window_bounds = array<i64: 2, 1>}, {transform_indices = @transform_7, window_bounds = array<i64: 2, 128>}]} {
    %c0 = arith.constant 0 : index
    %c0_0 = arith.constant 0 : index
    %0 = vector.load %arg1[%c0, %c0_0] : memref<14x128xbf16, #tpu.memory_space<vmem>>, vector<14x128xbf16>
    %c0_1 = arith.constant 0 : index
    %c0_2 = arith.constant 0 : index
    %1 = vector.load %arg2[%c0_1, %c0_2] : memref<32x14xbf16, #tpu.memory_space<vmem>>, vector<32x14xbf16>
    %cst = arith.constant dense<0.000000e+00> : vector<32x128xf32>
    %2 = tpu.matmul %1, %0, %cst {dimension_numbers = #tpu.dot_dimension_numbers<[1], [0], [0], [1], [0, 0, 1, 1], [], []>} : vector<32x14xbf16>, vector<14x128xbf16>, vector<32x128xf32> -> vector<32x128xf32>
    %c0_3 = arith.constant 0 : index
    %c0_4 = arith.constant 0 : index
    %3 = vector.load %arg3[%c0_3, %c0_4] : memref<32x1xf32, #tpu.memory_space<vmem>>, vector<32x1xf32>
    %4 = vector.broadcast %3 : vector<32x1xf32> to vector<32x128xf32>
    %5 = arith.addf %2, %4 : vector<32x128xf32>
    %cst_5 = arith.constant 0.000000e+00 : f32
    %6 = vector.broadcast %cst_5 : f32 to vector<32x128xf32>
    %7 = arith.maximumf %5, %6 : vector<32x128xf32>
    %8 = arith.truncf %7 : vector<32x128xf32> to vector<32x128xbf16>
    %c0_6 = arith.constant 0 : index
    %c0_7 = arith.constant 0 : index
    %9 = vector.load %arg4[%c0_6, %c0_7] : memref<16x32xbf16, #tpu.memory_space<vmem>>, vector<16x32xbf16>
    %cst_8 = arith.constant dense<0.000000e+00> : vector<16x128xf32>
    %10 = tpu.matmul %9, %8, %cst_8 {dimension_numbers = #tpu.dot_dimension_numbers<[1], [0], [0], [1], [0, 0, 1, 1], [], []>} : vector<16x32xbf16>, vector<32x128xbf16>, vector<16x128xf32> -> vector<16x128xf32>
    %c0_9 = arith.constant 0 : index
    %c0_10 = arith.constant 0 : index
    %11 = vector.load %arg5[%c0_9, %c0_10] : memref<16x1xf32, #tpu.memory_space<vmem>>, vector<16x1xf32>
    %12 = vector.broadcast %11 : vector<16x1xf32> to vector<16x128xf32>
    %13 = arith.addf %10, %12 : vector<16x128xf32>
    %cst_11 = arith.constant 0.000000e+00 : f32
    %14 = vector.broadcast %cst_11 : f32 to vector<16x128xf32>
    %15 = arith.maximumf %13, %14 : vector<16x128xf32>
    %16 = arith.truncf %15 : vector<16x128xf32> to vector<16x128xbf16>
    %c0_12 = arith.constant 0 : index
    %c0_13 = arith.constant 0 : index
    %17 = vector.load %arg6[%c0_12, %c0_13] : memref<2x16xbf16, #tpu.memory_space<vmem>>, vector<2x16xbf16>
    %cst_14 = arith.constant dense<0.000000e+00> : vector<2x128xf32>
    %18 = tpu.matmul %17, %16, %cst_14 {dimension_numbers = #tpu.dot_dimension_numbers<[1], [0], [0], [1], [0, 0, 1, 1], [], []>} : vector<2x16xbf16>, vector<16x128xbf16>, vector<2x128xf32> -> vector<2x128xf32>
    %c0_15 = arith.constant 0 : index
    %c0_16 = arith.constant 0 : index
    %19 = vector.load %arg7[%c0_15, %c0_16] : memref<2x1xf32, #tpu.memory_space<vmem>>, vector<2x1xf32>
    %20 = vector.broadcast %19 : vector<2x1xf32> to vector<2x128xf32>
    %21 = arith.addf %18, %20 : vector<2x128xf32>
    %c0_17 = arith.constant 0 : index
    %c0_18 = arith.constant 0 : index
    %22 = vector.load %arg8[%c0_17, %c0_18] : memref<2x128xf32, #tpu.memory_space<vmem>>, vector<2x128xf32>
    tpu.vector_store %arg8[%c0_17, %c0_18], %21 {strides = array<i32>} : memref<2x128xf32, #tpu.memory_space<vmem>>, vector<2x128xf32>,
    return
  }
  func.func @transform_0(%arg0: i32) -> (i32, i32) {
    %c0_i32 = arith.constant 0 : i32
    %c0_i32_0 = arith.constant 0 : i32
    return %c0_i32, %arg0 : i32, i32
  }
  func.func @transform_1(%arg0: i32) -> (i32, i32) {
    %c0_i32 = arith.constant 0 : i32
    %c0_i32_0 = arith.constant 0 : i32
    %c0_i32_1 = arith.constant 0 : i32
    return %c0_i32, %c0_i32_0 : i32, i32
  }
  func.func @transform_2(%arg0: i32) -> (i32, i32) {
    %c0_i32 = arith.constant 0 : i32
    %c0_i32_0 = arith.constant 0 : i32
    %c0_i32_1 = arith.constant 0 : i32
    return %c0_i32, %c0_i32_0 : i32, i32
  }
  func.func @transform_3(%arg0: i32) -> (i32, i32) {
    %c0_i32 = arith.constant 0 : i32
    %c0_i32_0 = arith.constant 0 : i32
    %c0_i32_1 = arith.constant 0 : i32
    return %c0_i32, %c0_i32_0 : i32, i32
  }
  func.func @transform_4(%arg0: i32) -> (i32, i32) {
    %c0_i32 = arith.constant 0 : i32
    %c0_i32_0 = arith.constant 0 : i32
    %c0_i32_1 = arith.constant 0 : i32
    return %c0_i32, %c0_i32_0 : i32, i32
  }
  func.func @transform_5(%arg0: i32) -> (i32, i32) {
    %c0_i32 = arith.constant 0 : i32
    %c0_i32_0 = arith.constant 0 : i32
    %c0_i32_1 = arith.constant 0 : i32
    return %c0_i32, %c0_i32_0 : i32, i32
  }
  func.func @transform_6(%arg0: i32) -> (i32, i32) {
    %c0_i32 = arith.constant 0 : i32
    %c0_i32_0 = arith.constant 0 : i32
    %c0_i32_1 = arith.constant 0 : i32
    return %c0_i32, %c0_i32_0 : i32, i32
  }
  func.func @transform_7(%arg0: i32) -> (i32, i32) {
    %c0_i32 = arith.constant 0 : i32
    %c0_i32_0 = arith.constant 0 : i32
    return %c0_i32, %arg0 : i32, i32
  }
}

</mosaic_0001>

<bundles_post_ra>
// kernel: depression_nn_forward.1
= control target key start
LH: loop header
LB: loop body
LE: loop exit
PB: predicated region body
PF: predicated region fallthrough
CT: control target
= control target key end

     0   :  { %vm79_vm0 = vcmask 1046528   ;;  %vm72_vm1 = vcmask 113664   ;;  %v307_v1 = vmov 0   ;;  %v308_v12 = vmov 0.0   ;;  %s391_s0 = inlined_call_operand.vmem [shape: bf16[14,128], index: 0, kind: input, shape index: {}]   ;;  %s392_s1 = inlined_call_operand.vmem [shape: bf16[32,14], index: 1, kind: input, shape index: {}]   ;;  %s393_s2 = inlined_call_operand.vmem [shape: f32[32,1], index: 2, kind: input, shape index: {}]   ;;  %s394_s4 = inlined_call_operand.vmem [shape: f32[16,1], index: 4, kind: input, shape index: {}]   ;;  %s395_s6 = inlined_call_operand.vmem [shape: f32[2,1], index: 6, kind: input, shape index: {}]   ;;  %s396_s3 = inlined_call_operand.vmem [shape: bf16[16,32], index: 3, kind: input, shape index: {}]   ;;  %s397_s5 = inlined_call_operand.vmem [shape: bf16[2,16], index: 5, kind: input, shape index: {}]   ;;  %s398_s7 = inlined_call_operand.vmem [shape: f32[2,128], index: 7, kind: output, shape index: {}]  }
   0x1   :  { %v303_v0 = vld [vmem:[%s391_s0] sm:$0x7f]   ;;  %301 = vset.pattern.permute.xlu0 %v307_v1  ;;  %302 = vset.pattern.permute.xlu1 %v307_v1  ;;  %v305_v4 = vld [vmem:[%s392_s1 + $0x8] sm:$0xff]   ;;  %v35_v6 = vld [vmem:[%s393_s2 + $0x10] sm:$0xff]  ;;  %vm309_vm2 = vmmov 0   ;;  %vm157_vm3 = vcmask 261120  }
   0x2   :  { %v304_v2 = vld [vmem:[%s392_s1] sm:$0xff]   ;;  %297 = vmatprep.subr.msk.bf16.mxu0 %vm79_vm0, %v303_v0  ;;  %v81_v3 = vsel %vm79_vm0, %v303_v0, 0  ;;  %49 = vperm.xlu1 %302, %v35_v6   ;;  %v34_v7 = vld [vmem:[%s393_s2 + $0x8] sm:$0xff]  ;;  %v36_v8 = vld [vmem:[%s393_s2 + $0x18] sm:$0xff]  ;;  %vm212_vm4 = vcmask 130048  }
   0x3   :  { %278 = vmatpush3.bf16.msra.mxu0 %v81_v3  ;;  %279 = vmatprep.mubr.msk.bf16.mxu0 %vm72_vm1, %v304_v2  ;;  %v33_v5 = vld [vmem:[%s393_s2] sm:$0xff]  ;;  %v141_v10 = vld [vmem:[%s394_s4 + $0x8] sm:$0xff] }
   0x4   :  { %39 = vperm.xlu0 %301, %v33_v5   ;;  %v140_v9 = vld [vmem:[%s394_s4] sm:$0xff]  ;;  %283 = vmatprep.subr.bf16.mxu1 %v308_v12 }
   0x5   :  { %v206_v11 = vld [vmem:[%s395_s6] sm:$0x3]  ;;  %291 = vmatprep.subr.bf16.mxu0 %v308_v12  ;;  %287 = vmatprep.mubr.msk.bf16.mxu1 %vm309_vm2, %v308_v12 }
   0x6   :  { %280 = vmatmul.mubr.msk.bf16.vlgmr.msra.gmra.mrb[0].mxu0 %vm72_vm1, %v305_v4  ;;  %54 = vperm.xlu1 %302, %v36_v8   ;;  %v306_v31 = vld [vmem:[%s396_s3] sm:$0xff]  }
   0x7   :  { %293 = vmatprep.mubr.msk.bf16.mxu0 %vm309_vm2, %v308_v12  ;;  %v205_v43 = vld [vmem:[%s397_s5] sm:$0x1] }
   0x8   :  { %44 = vperm.xlu0 %301, %v34_v7  }
   0xa   :  { %149 = vperm.xlu1 %302, %v141_v10  }
   0xc   :  { %144 = vperm.xlu0 %301, %v140_v9  }
  0x10   :  { %209 = vperm.xlu0 %301, %v206_v11  }
  0x81   :  { %v50_v13 = vpop.permute.xlu1 %49 }
  0x83   :  { %v40_v14 = vpop.permute.xlu0 %39 }
  0x85   :  { %v55_v18 = vpop.permute.xlu1 %54 }
  0x87   :  { %v45_v21 = vpop.permute.xlu0 %44 }
  0x89   :  { %v150_v36 = vpop.permute.xlu1 %149 }
  0x8b   :  { %v145_v32 = vpop.permute.xlu0 %144 }
  0x8f   :  { %v210_v44 = vpop.permute.xlu0 %209 }
  0xd9   :  { %v281_v15 = vpop.f32.mrb[0].mxu0 }
  0xda   :  { %v126_v16 = vadd.f32 %v281_v15, %v50_v13  ;;  %v117_v17 = vpop.f32.mrb[1].mxu0 }
  0xdb   :  { %v118_v19 = vadd.f32 %v117_v17, %v40_v14  ;;  %v282_v20 = vpop.f32.mrb[2].mxu0 }
  0xdc   :  { %v129_v22 = vadd.f32 %v282_v20, %v55_v18  ;;  %v120_v23 = vpop.f32.mrb[3].mxu0  ;;  %v134_v25 = vmax.f32 %v126_v16, 0.0 }
  0xdd   :  { %v121_v24 = vadd.f32 %v120_v23, %v45_v21  ;;  %v132_v27 = vmax.f32 %v118_v19, 0.0 }
  0xde   :  { %v135_v26 = vmax.f32 %v129_v22, 0.0 }
  0xdf   :  { %v133_v28 = vmax.f32 %v121_v24, 0.0 }
  0xe0   :  { %v137_v29 = vpack.c.bf16 %v135_v26, %v134_v25 }
  0xe1   :  { %v136_v30 = vpack.c.bf16 %v133_v28, %v132_v27 }
  0xe3   :  { %284 = vmatpush3.bf16.msra.mxu1 %v136_v30 }
  0xe4   :  { %285 = vmatprep.subr.bf16.mxu1 %v308_v12 }
  0xe7   :  { %286 = vmatpush3.bf16.msra.mxu1 %v137_v29 }
  0xea   :  { %288 = vmatmul.mubr.msk.bf16.vlgmr.msra.gmra.mrb[0].mxu1 %vm157_vm3, %v306_v31 }
 0x1bd   :  { %v195_v33 = vpop.f32.mrb[0].mxu1 }
 0x1be   :  { %v196_v34 = vadd.f32 %v195_v33, %v145_v32  ;;  %v289_v35 = vpop.f32.mrb[1].mxu1 }
 0x1bf   :  { %v198_v37 = vpop.f32.mrb[2].mxu1 }
 0x1c0   :  { %v199_v38 = vadd.f32 %v198_v37, %v150_v36  ;;  %v290_v39 = vpop.f32.mrb[3].mxu1  ;;  %v202_v40 = vmax.f32 %v196_v34, 0.0 }
 0x1c2   :  { %v203_v41 = vmax.f32 %v199_v38, 0.0 }
 0x1c4   :  { %v204_v42 = vpack.c.bf16 %v203_v41, %v202_v40 }
 0x1c6   :  { %292 = vmatpush3.bf16.msra.mxu0 %v204_v42 }
 0x1c9   :  { %294 = vmatmul.mubr.msk.bf16.vlgmr.msra.gmra.mrb[4].mxu0 %vm212_vm4, %v205_v43 }
 0x29c   :  { %v250_v45 = vpop.f32.mrb[4].mxu0 }
 0x29d   :  { %v251_v46 = vadd.f32 %v250_v45, %v210_v44  ;;  %v295_v47 = vpop.f32.mrb[5].mxu0 }
 0x29e   :  { %v253_v48 = vpop.f32.mrb[6].mxu0 }
 0x29f   :  { %256 = vst [vmem:[%s398_s7] sm:$0x3] %v251_v46  ;;  %v296_v49 = vpop.f32.mrb[7].mxu0 }

</bundles_post_ra>
